<compile_context>
chip_gen: v7x
topology: tpu7x:2x2x1
jax: 0.10.0
libtpu: 0.0.40
codegen_flags: <defaults>
</compile_context>

<pallas_src>
import jax
import jax.numpy as jnp
from jax.experimental import pallas as pl
from jax.experimental.pallas import tpu as pltpu

DROP = 1


def _sigmoid(z):
    # Numerically-stable sigmoid: bounded tanh form (maps to the EUP slot).
    return 0.5 * (jnp.tanh(0.5 * z) + 1.0)


def mymodel_process(x, params):
    """Synthetic gen + faithful MyModel.process post-processing, fused.

    Returns (cls_output (B,1), mask_output (B*(V-DROP), 1, H, W))."""
    wm, bm, wc, bc = params
    B, V, Cin, H, W = x.shape
    Vd = V - DROP
    HW = H * W
    inv_pool = 1.0 / float(V * HW)

    # Fold the 2-class softmax into sigmoid of the logit difference at trace
    # time: softmax(l)[1] == sigmoid(l1 - l0).
    wm_col = (wm[:, 1] - wm[:, 0]).astype(jnp.float32).reshape(1, Cin, 1)
    wc_col = (wc[:, 1] - wc[:, 0]).astype(jnp.float32).reshape(1, Cin, 1)
    bd = jnp.stack([bm[1] - bm[0], bc[1] - bc[0]]).astype(jnp.float32)  # (2,)

    # Pure reshape (no HBM copy): H*W stays on the 128-lane axis.
    x3 = x.reshape(B * V, Cin, HW)

    def kernel(x_ref, wm_ref, wc_ref, bd_ref, mask_ref, cls_ref):
        # x_ref:    (B*V, Cin, HW) VMEM   wm_ref/wc_ref: (1, Cin, 1) VMEM
        # bd_ref:   (2,) SMEM  [mask bias diff, cls bias diff]
        # mask_ref: (B, Vd, HW) VMEM out   cls_ref: (B, 1) VMEM out
        bmd = bd_ref[0]                       # hoisted scalar loads
        bcd = bd_ref[1]
        wm_v = wm_ref[...]                    # (1, Cin, 1)
        wc_v = wc_ref[...]                    # (1, Cin, 1)

        for b in range(B):                    # static unroll, B is tiny
            slab = x_ref[b * V:(b + 1) * V]   # (V, Cin, HW) slab load
            # mask head: dropped frame excluded; one dense store per batch.
            m_logit = jnp.sum(slab[:Vd] * wm_v, axis=1) + bmd   # (Vd, HW)
            mask_ref[b] = _sigmoid(m_logit)
            # cls head: global average pool folded into the weighted sum.
            csum = jnp.sum(slab * wc_v, axis=0)                 # (Cin, HW)
            csum = jnp.sum(csum, axis=0, keepdims=True)         # (1, HW)
            tot = jnp.sum(csum, axis=1, keepdims=True)          # (1, 1)
            clogit = tot * inv_pool + bcd
            cls_ref[b:b + 1, :] = _sigmoid(clogit)

    mask_p, cls_p = pl.pallas_call(
        kernel,
        out_shape=(
            jax.ShapeDtypeStruct((B, Vd, HW), jnp.float32),
            jax.ShapeDtypeStruct((B, 1), jnp.float32),
        ),
        in_specs=[
            pl.BlockSpec(memory_space=pltpu.MemorySpace.VMEM),   # x3 (whole)
            pl.BlockSpec(memory_space=pltpu.MemorySpace.VMEM),   # wm_col
            pl.BlockSpec(memory_space=pltpu.MemorySpace.VMEM),   # wc_col
            pl.BlockSpec(memory_space=pltpu.MemorySpace.SMEM),   # bias diffs
        ],
        out_specs=(
            pl.BlockSpec(memory_space=pltpu.MemorySpace.VMEM),
            pl.BlockSpec(memory_space=pltpu.MemorySpace.VMEM),
        ),
    )(x3, wm_col, wc_col, bd)

    mask_output = mask_p.reshape(B * Vd, 1, H, W)
    cls_output = cls_p                      # already (B, 1)
    return cls_output, mask_output


def _reference(x, params):
    """Pure-JAX reference mirroring the PyTorch process() semantics."""
    wm, bm, wc, bc = params
    B, V, Cin, H, W = x.shape
    # gen stand-in
    mask_logits = jnp.einsum('bvchw,cd->bvdhw', x, wm) + bm[None, None, :,
                                                            None, None]
    pooled = jnp.mean(x, axis=(1, 3, 4))
    cls_logits = pooled @ wc + bc
    # process()
    mask_logits = mask_logits[:, :-DROP]
    cls_sm = jax.nn.softmax(cls_logits, axis=1)[:, 1:2]
    mask_sm = jax.nn.softmax(mask_logits, axis=2)[:, :, 1:2, :, :]
    return cls_sm.reshape(-1, 1), mask_sm.reshape(-1, 1, H, W)


if __name__ == "__main__":
    key = jax.random.PRNGKey(0)
    kx, kwm, kbm, kwc, kbc = jax.random.split(key, 5)

    B, V, Cin, H, W = 2, 4, 4, 16, 16
    x = jax.random.normal(kx, (B, V, Cin, H, W), dtype=jnp.float32)

    # deterministic synthetic parameters
    wm = jax.random.normal(kwm, (Cin, 2), dtype=jnp.float32) * 0.5  # mask 1x1 conv
    bm = jax.random.normal(kbm, (2,), dtype=jnp.float32) * 0.1
    wc = jax.random.normal(kwc, (Cin, 2), dtype=jnp.float32) * 0.5  # cls linear
    bc = jax.random.normal(kbc, (2,), dtype=jnp.float32) * 0.1
    params = (wm, bm, wc, bc)

    cls_out, mask_out = mymodel_process(x, params)
    cls_out = jax.block_until_ready(cls_out)
    mask_out = jax.block_until_ready(mask_out)

    cls_ref, mask_ref = _reference(x, params)
    assert cls_out.shape == (B, 1)
    assert mask_out.shape == (B * (V - DROP), 1, H, W)
    assert jnp.allclose(cls_out, cls_ref, atol=1e-5, rtol=1e-5)
    assert jnp.allclose(mask_out, mask_ref, atol=1e-5, rtol=1e-5)

    print("KERNEL_OK")
</pallas_src>

<mosaic_0001>
module attributes {stable_mosaic.version = 11 : i64} {
  func.func @kernel(%arg0: memref<8x4x256xf32, #tpu.memory_space<vmem>>, %arg1: memref<1x4x1xf32, #tpu.memory_space<vmem>>, %arg2: memref<1x4x1xf32, #tpu.memory_space<vmem>>, %arg3: memref<2xf32, #tpu.memory_space<smem>>, %arg4: memref<2x3x256xf32, #tpu.memory_space<vmem>>, %arg5: memref<2x1xf32, #tpu.memory_space<vmem>>) attributes {dimension_semantics = [], scalar_prefetch = 0 : i64, scratch_operands = 0 : i64, tpu.core_type = #tpu.core_type<tc>} {
    %c0 = arith.constant 0 : index
    %0 = memref.load %arg3[%c0] : memref<2xf32, #tpu.memory_space<smem>>
    %c1 = arith.constant 1 : index
    %1 = memref.load %arg3[%c1] : memref<2xf32, #tpu.memory_space<smem>>
    %c0_0 = arith.constant 0 : index
    %c0_1 = arith.constant 0 : index
    %c0_2 = arith.constant 0 : index
    %2 = vector.load %arg1[%c0_0, %c0_1, %c0_2] : memref<1x4x1xf32, #tpu.memory_space<vmem>>, vector<1x4x1xf32>
    %c0_3 = arith.constant 0 : index
    %c0_4 = arith.constant 0 : index
    %c0_5 = arith.constant 0 : index
    %3 = vector.load %arg2[%c0_3, %c0_4, %c0_5] : memref<1x4x1xf32, #tpu.memory_space<vmem>>, vector<1x4x1xf32>
    %c0_6 = arith.constant 0 : index
    %c0_7 = arith.constant 0 : index
    %c0_8 = arith.constant 0 : index
    %4 = vector.load %arg0[%c0_6, %c0_7, %c0_8] : memref<8x4x256xf32, #tpu.memory_space<vmem>>, vector<4x4x256xf32>
    %5 = vector.extract_strided_slice %4 {offsets = [0, 0, 0], sizes = [3, 4, 256], strides = [1, 1, 1]} : vector<4x4x256xf32> to vector<3x4x256xf32>
    %6 = vector.broadcast %2 : vector<1x4x1xf32> to vector<3x4x256xf32>
    %7 = arith.mulf %5, %6 : vector<3x4x256xf32>
    %cst = arith.constant dense<0.000000e+00> : vector<3x256xf32>
    %8 = vector.multi_reduction <add>, %7, %cst [1] : vector<3x4x256xf32> to vector<3x256xf32>
    %9 = vector.broadcast %0 : f32 to vector<3x256xf32>
    %10 = arith.addf %8, %9 : vector<3x256xf32>
    %cst_9 = arith.constant 5.000000e-01 : f32
    %11 = vector.broadcast %cst_9 : f32 to vector<3x256xf32>
    %12 = arith.mulf %11, %10 : vector<3x256xf32>
    %13 = math.tanh %12 : vector<3x256xf32>
    %cst_10 = arith.constant 1.000000e+00 : f32
    %14 = vector.broadcast %cst_10 : f32 to vector<3x256xf32>
    %15 = arith.addf %13, %14 : vector<3x256xf32>
    %cst_11 = arith.constant 5.000000e-01 : f32
    %16 = vector.broadcast %cst_11 : f32 to vector<3x256xf32>
    %17 = arith.mulf %16, %15 : vector<3x256xf32>
    %c0_12 = arith.constant 0 : index
    %c0_13 = arith.constant 0 : index
    %c0_14 = arith.constant 0 : index
    %18 = vector.load %arg4[%c0_12, %c0_13, %c0_14] : memref<2x3x256xf32, #tpu.memory_space<vmem>>, vector<1x3x256xf32>
    %19 = vector.shape_cast %18 : vector<1x3x256xf32> to vector<3x256xf32>
    %20 = vector.shape_cast %17 : vector<3x256xf32> to vector<1x3x256xf32>
    tpu.vector_store %arg4[%c0_12, %c0_13, %c0_14], %20 {strides = array<i32>} : memref<2x3x256xf32, #tpu.memory_space<vmem>>, vector<1x3x256xf32>,
    %21 = vector.broadcast %3 : vector<1x4x1xf32> to vector<4x4x256xf32>
    %22 = arith.mulf %4, %21 : vector<4x4x256xf32>
    %cst_15 = arith.constant dense<0.000000e+00> : vector<4x256xf32>
    %23 = vector.multi_reduction <add>, %22, %cst_15 [0] : vector<4x4x256xf32> to vector<4x256xf32>
    %cst_16 = arith.constant dense<0.000000e+00> : vector<256xf32>
    %24 = vector.multi_reduction <add>, %23, %cst_16 [0] : vector<4x256xf32> to vector<256xf32>
    %25 = vector.shape_cast %24 : vector<256xf32> to vector<1x256xf32>
    %cst_17 = arith.constant dense<0.000000e+00> : vector<1xf32>
    %26 = vector.multi_reduction <add>, %25, %cst_17 [1] : vector<1x256xf32> to vector<1xf32>
    %27 = vector.shape_cast %26 : vector<1xf32> to vector<1x1xf32>
    %cst_18 = arith.constant 9.765625E-4 : f32
    %28 = vector.broadcast %cst_18 : f32 to vector<1x1xf32>
    %29 = arith.mulf %27, %28 : vector<1x1xf32>
    %30 = vector.broadcast %1 : f32 to vector<1x1xf32>
    %31 = arith.addf %29, %30 : vector<1x1xf32>
    %cst_19 = arith.constant 5.000000e-01 : f32
    %32 = vector.broadcast %cst_19 : f32 to vector<1x1xf32>
    %33 = arith.mulf %32, %31 : vector<1x1xf32>
    %34 = math.tanh %33 : vector<1x1xf32>
    %cst_20 = arith.constant 1.000000e+00 : f32
    %35 = vector.broadcast %cst_20 : f32 to vector<1x1xf32>
    %36 = arith.addf %34, %35 : vector<1x1xf32>
    %cst_21 = arith.constant 5.000000e-01 : f32
    %37 = vector.broadcast %cst_21 : f32 to vector<1x1xf32>
    %38 = arith.mulf %37, %36 : vector<1x1xf32>
    %c0_22 = arith.constant 0 : index
    %c0_23 = arith.constant 0 : index
    %39 = vector.load %arg5[%c0_22, %c0_23] : memref<2x1xf32, #tpu.memory_space<vmem>>, vector<1x1xf32>
    tpu.vector_store %arg5[%c0_22, %c0_23], %38 {strides = array<i32>} : memref<2x1xf32, #tpu.memory_space<vmem>>, vector<1x1xf32>,
    %c4 = arith.constant 4 : index
    %c0_24 = arith.constant 0 : index
    %c0_25 = arith.constant 0 : index
    %40 = vector.load %arg0[%c4, %c0_24, %c0_25] : memref<8x4x256xf32, #tpu.memory_space<vmem>>, vector<4x4x256xf32>
    %41 = vector.extract_strided_slice %40 {offsets = [0, 0, 0], sizes = [3, 4, 256], strides = [1, 1, 1]} : vector<4x4x256xf32> to vector<3x4x256xf32>
    %42 = vector.broadcast %2 : vector<1x4x1xf32> to vector<3x4x256xf32>
    %43 = arith.mulf %41, %42 : vector<3x4x256xf32>
    %cst_26 = arith.constant dense<0.000000e+00> : vector<3x256xf32>
    %44 = vector.multi_reduction <add>, %43, %cst_26 [1] : vector<3x4x256xf32> to vector<3x256xf32>
    %45 = vector.broadcast %0 : f32 to vector<3x256xf32>
    %46 = arith.addf %44, %45 : vector<3x256xf32>
    %cst_27 = arith.constant 5.000000e-01 : f32
    %47 = vector.broadcast %cst_27 : f32 to vector<3x256xf32>
    %48 = arith.mulf %47, %46 : vector<3x256xf32>
    %49 = math.tanh %48 : vector<3x256xf32>
    %cst_28 = arith.constant 1.000000e+00 : f32
    %50 = vector.broadcast %cst_28 : f32 to vector<3x256xf32>
    %51 = arith.addf %49, %50 : vector<3x256xf32>
    %cst_29 = arith.constant 5.000000e-01 : f32
    %52 = vector.broadcast %cst_29 : f32 to vector<3x256xf32>
    %53 = arith.mulf %52, %51 : vector<3x256xf32>
    %c1_30 = arith.constant 1 : index
    %c0_31 = arith.constant 0 : index
    %c0_32 = arith.constant 0 : index
    %54 = vector.load %arg4[%c1_30, %c0_31, %c0_32] : memref<2x3x256xf32, #tpu.memory_space<vmem>>, vector<1x3x256xf32>
    %55 = vector.shape_cast %54 : vector<1x3x256xf32> to vector<3x256xf32>
    %56 = vector.shape_cast %53 : vector<3x256xf32> to vector<1x3x256xf32>
    tpu.vector_store %arg4[%c1_30, %c0_31, %c0_32], %56 {strides = array<i32>} : memref<2x3x256xf32, #tpu.memory_space<vmem>>, vector<1x3x256xf32>,
    %57 = vector.broadcast %3 : vector<1x4x1xf32> to vector<4x4x256xf32>
    %58 = arith.mulf %40, %57 : vector<4x4x256xf32>
    %cst_33 = arith.constant dense<0.000000e+00> : vector<4x256xf32>
    %59 = vector.multi_reduction <add>, %58, %cst_33 [0] : vector<4x4x256xf32> to vector<4x256xf32>
    %cst_34 = arith.constant dense<0.000000e+00> : vector<256xf32>
    %60 = vector.multi_reduction <add>, %59, %cst_34 [0] : vector<4x256xf32> to vector<256xf32>
    %61 = vector.shape_cast %60 : vector<256xf32> to vector<1x256xf32>
    %cst_35 = arith.constant dense<0.000000e+00> : vector<1xf32>
    %62 = vector.multi_reduction <add>, %61, %cst_35 [1] : vector<1x256xf32> to vector<1xf32>
    %63 = vector.shape_cast %62 : vector<1xf32> to vector<1x1xf32>
    %cst_36 = arith.constant 9.765625E-4 : f32
    %64 = vector.broadcast %cst_36 : f32 to vector<1x1xf32>
    %65 = arith.mulf %63, %64 : vector<1x1xf32>
    %66 = vector.broadcast %1 : f32 to vector<1x1xf32>
    %67 = arith.addf %65, %66 : vector<1x1xf32>
    %cst_37 = arith.constant 5.000000e-01 : f32
    %68 = vector.broadcast %cst_37 : f32 to vector<1x1xf32>
    %69 = arith.mulf %68, %67 : vector<1x1xf32>
    %70 = math.tanh %69 : vector<1x1xf32>
    %cst_38 = arith.constant 1.000000e+00 : f32
    %71 = vector.broadcast %cst_38 : f32 to vector<1x1xf32>
    %72 = arith.addf %70, %71 : vector<1x1xf32>
    %cst_39 = arith.constant 5.000000e-01 : f32
    %73 = vector.broadcast %cst_39 : f32 to vector<1x1xf32>
    %74 = arith.mulf %73, %72 : vector<1x1xf32>
    %c1_40 = arith.constant 1 : index
    %c0_41 = arith.constant 0 : index
    %75 = vector.load %arg5[%c1_40, %c0_41] : memref<2x1xf32, #tpu.memory_space<vmem>>, vector<1x1xf32>
    tpu.vector_store %arg5[%c1_40, %c0_41], %74 {strides = array<i32>} : memref<2x1xf32, #tpu.memory_space<vmem>>, vector<1x1xf32>,
    return
  }
}

</mosaic_0001>

<bundles_post_ra>
// kernel: tpu_custom_call.1
= control target key start
LH: loop header
LB: loop body
LE: loop exit
PB: predicated region body
PF: predicated region fallthrough
CT: control target
= control target key end

     0   :  { %11 = vsyncpa [#allocation3], 0  ;;  %s655_s0 = inlined_call_operand.hbm [shape: f32[8,4,256], index: 0, kind: input, shape index: {}]   ;;  %s656_s1 = inlined_call_operand.vmem [shape: f32[1,4,1], index: 1, kind: input, shape index: {}]   ;;  %s657_s2 = inlined_call_operand.vmem [shape: f32[1,4,1], index: 2, kind: input, shape index: {}]   ;;  %s658_s3 = inlined_call_operand.vmem [shape: f32[2], index: 3, kind: input, shape index: {}]   ;;  %s659_s4 = inlined_call_operand.vmem [shape: f32[2,3,256], index: 4, kind: output, shape index: {0}]   ;;  %s660_s5 = inlined_call_operand.vmem [shape: f32[2,1], index: 5, kind: output, shape index: {1}]  }
   0x1   :  { %12 = vsyncpa [#allocation4], 0  ;;  %s487_s18 = smov [#allocation2]   ;;  %s35_s22 = sshll.u32 %s658_s3, 4  ;;  %s36_s22 = int_to_ptr.vmem [resolvable:$true] %s35_s22 }
   0x2   :  { %s18_s19 = sshll.u32 %s487_s18, 4  ;;  %s449_s25 = scalar_lea.hbm %s655_s0, 1024  ;;  %s19_s19 = int_to_ptr.vmem [resolvable:$true] %s18_s19 }
   0x3   :  { %p450_p0 = scmp.ne.s32.totalorder %s655_s0, %s449_s25  ;;  %p453_p1 = scmp.lt.u32.totalorder %s449_s25, %s655_s0 }
   0x5   :  { %p455_p2 = pnand %p453_p1, %p450_p0 }
   0x7   :  { %458 = shalt.err (!%p455_p2)
}
   0x8   :  { %s459_s30 = scalar_lea.vmem %s19_s19, 1024  ;;  %p464_p4 = scmp.lt.s32.totalorder %s19_s19, %s19_s19 }
   0x9   :  { %p460_p3 = scmp.ne.s32.totalorder %s19_s19, %s459_s30  ;;  %p465_p5 = scmp.lt.s32.totalorder %s459_s30, %s459_s30 }
   0xb   :  { %p466_p6 = por %p465_p5, %p464_p4 }
   0xd   :  { %p467_p7 = pnand %p466_p6, %p460_p3 }
   0xf   :  { %470 = shalt.err (!%p467_p7)
}
  0x10   :  { %s488_s3 = smov 128   ;;  %s489_s6 = smov 8  }
  0x11   :  { %24 = dma.hbm_to_vmem [thread:$0]  %s655_s0, 1024, %s19_s19, [#allocation3], %s488_s3, %s488_s3, %s489_s6  }
  0x12   :  { %s471_s9 = scalar_lea.vmem %s36_s22, 16  ;;  %p476_p9 = scmp.lt.s32.totalorder %s36_s22, %s36_s22 }
  0x13   :  { %p472_p8 = scmp.ne.s32.totalorder %s36_s22, %s471_s9  ;;  %p477_p10 = scmp.lt.s32.totalorder %s471_s9, %s471_s9 }
  0x15   :  { %p478_p11 = por %p477_p10, %p476_p9 }
  0x17   :  { %p479_p12 = pnand %p478_p11, %p472_p8 }
  0x19   :  { %482 = shalt.err (!%p479_p12)
}
  0x1a   :  { %s490_s10 = smov [#allocation5]  }
  0x1b   :  { %38 = dma.vmem_to_smem %s36_s22, 16, %s490_s10, [#allocation4]  }
  0x1c   :  { %483 = dma.done.wait [#allocation3], 1024  }
  0x1d   :  { %484 = vsyncadd [#allocation3], 4294966272 }
  0x1e   :  { %485 = dma.done.wait [#allocation4], 16  }
  0x1f   :  { %486 = vsyncadd [#allocation4], 4294967280 }
  0x20   :  { %45 = sfence }
  0x21   :  { %v49_v0 = vld [vmem:[%s657_s2] sm:$0xf]  ;;  %v491_v1 = vmov 0   ;;  %v492_v3 = vmov 839922192   ;;  %v61_v5 = vlaneseq  ;;  %v51_v11 = vld [vmem:[#allocation2 + $0x8] sm:$0xff] }
  0x22   :  { %420 = vset.pattern.permute.xlu0 %v491_v1  ;;  %v48_v2 = vld [vmem:[%s656_s1] sm:$0xf]  ;;  %v59_v4 = vunpack.c.l.s4 %v492_v3  ;;  %v546_v13 = vld [vmem:[#allocation2 + $0x10] sm:$0xff]  ;;  %vm78_vm0 = vcmask 1043456   ;;  %v53_v14 = vld [vmem:[#allocation2 + $0x18] sm:$0xff]  ;;  %s46_s1 = sld [smem:[#allocation5]] }
  0x23   :  { %175 = vperm.xlu0 %420, %v49_v0   ;;  %v62_v7 = vshrl.u32 %v61_v5, 7  ;;  %v50_v10 = vld [vmem:[#allocation2] sm:$0xff]  ;;  %v554_v23 = vld [vmem:[#allocation2 + $0x28] sm:$0xff]  ;;  %vm162_vm1 = vcmask 1041409   ;;  %vm164_vm2 = vcmask 1045509   ;;  %vm167_vm3 = vcmask 1042434  }
  0x24   :  { %v60_v6 = vunpack.c.0.s8 %v59_v4  ;;  %v242_v22 = vld [vmem:[#allocation2 + $0x20] sm:$0xff]  ;;  %vm169_vm4 = vcmask 1046534   ;;  %s412_s17 = sld [smem:[#allocation5 + $0x1]]  ;;  %vm239_vm5 = vcmask 0  }
  0x26   :  { %v63_v8 = vsub.s32 %v60_v6, %v62_v7 }
  0x27   :  { %56 = vperm.xlu0 %420, %v48_v2  }
  0xa2   :  { %v176_v9 = vpop.permute.xlu0 %175 }
  0xa3   :  { %v544_v12 = vrot.slane %v176_v9, %v63_v8 }
  0xa5   :  { %v185_v15 = vmul.f32 %v544_v12, %v50_v10  ;;  %v186_v16 = vmul.f32 %v544_v12, %v51_v11  ;;  %v187_v18 = vmul.f32 %v544_v12, %v546_v13  ;;  %v188_v24 = vmul.f32 %v544_v12, %v53_v14 }
  0xa6   :  { %v57_v17 = vpop.permute.xlu0 %56 }
  0xa7   :  { %v552_v19 = vrot.slane %v57_v17, %v63_v8  ;;  %v193_v20 = vcombine.high %v185_v15, %v185_v15  ;;  %v194_v21 = vcombine.high %v186_v16, %v186_v16  ;;  %v201_v25 = vsel %vm78_vm0, %v185_v15, 0.0 }
  0xa8   :  { %v202_v26 = vsel %vm78_vm0, %v186_v16, 0.0  ;;  %v195_v30 = vcombine.high %v187_v18, %v187_v18  ;;  %v204_v34 = vsel %vm78_vm0, %v187_v18, 0.0  ;;  %v196_v35 = vcombine.high %v188_v24, %v188_v24 }
  0xa9   :  { %v246_v27 = vmul.f32 %v242_v22, %v552_v19  ;;  %v247_v28 = vmul.f32 %v554_v23, %v552_v19  ;;  %v203_v29 = vadd.f32 %v202_v26, %v201_v25  ;;  %v208_v31 = vsel %vm78_vm0, %v193_v20, 0.0 }
  0xaa   :  { %v209_v32 = vsel %vm78_vm0, %v194_v21, 0.0  ;;  %v66_v40 = vmul.f32 %v552_v19, %v50_v10  ;;  %v206_v41 = vsel %vm78_vm0, %v188_v24, 0.0  ;;  %v211_v42 = vsel %vm78_vm0, %v195_v30, 0.0 }
  0xab   :  { %v253_v33 = vcombine.high %v247_v28, %v247_v28  ;;  %v205_v36 = vadd.f32 %v204_v34, %v203_v29  ;;  %v210_v37 = vadd.f32 %v209_v32, %v208_v31  ;;  %v252_v38 = vcombine.high %v246_v27, %v246_v27 }
  0xac   :  { %v272_v39 = vsel %vm78_vm0, %v247_v28, 0.0  ;;  %v72_v46 = vcombine.high %v66_v40, %v66_v40  ;;  %v213_v48 = vsel %vm78_vm0, %v196_v35, 0.0  ;;  %v258_v49 = vsel %vm78_vm0, %v246_v27, 0.0 }
  0xad   :  { %v279_v43 = vsel %vm78_vm0, %v253_v33, 0.0  ;;  %v207_v44 = vadd.f32 %v206_v41, %v205_v36  ;;  %v212_v45 = vadd.f32 %v211_v42, %v210_v37  ;;  %v273_v47 = vrot.slane %v272_v39, 4  ;;  %v591_v42 = vld [vmem:[#allocation2 + $0x30] sm:$0xff] }
  0xae   :  { %v265_v50 = vsel %vm78_vm0, %v252_v38, 0.0  ;;  %v280_v53 = vrot.slane %v279_v43, 4  ;;  %v79_v56 = vsel %vm78_vm0, %v66_v40, 0.0  ;;  %v86_v57 = vsel %vm78_vm0, %v72_v46, 0.0 }
  0xaf   :  { %v214_v51 = vadd.f32 %v213_v48, %v212_v45  ;;  %v215_v52 = vsel %vm78_vm0, %v207_v44, 0.0  ;;  %v259_v58 = vrot.slane %v258_v49, 4  ;;  %v266_v59 = vrot.slane %v265_v50, 4 }
  0xb0   :  { %v216_v54 = vrot.slane %v215_v52, 4  ;;  %v274_v60 = vadd.f32 %v273_v47, %v272_v39  ;;  %v80_v63 = vrot.slane %v79_v56, 4  ;;  %v87_v0 = vrot.slane %v86_v57, 4 }
  0xb1   :  { %v222_v55 = vsel %vm78_vm0, %v214_v51, 0.0  ;;  %v281_v1 = vadd.f32 %v280_v53, %v279_v43  ;;  %v67_v2 = vmul.f32 %v552_v19, %v51_v11  ;;  %v260_v7 = vadd.f32 %v259_v58, %v258_v49  ;;  %v245_v43 = vld [vmem:[#allocation2 + $0x38] sm:$0xff] }
  0xb2   :  { %v217_v61 = vadd.f32 %v216_v54, %v215_v52  ;;  %v223_v62 = vrot.slane %v222_v55, 4  ;;  %v81_v5 = vadd.f32 %v80_v63, %v79_v56  ;;  %v88_v6 = vadd.f32 %v87_v0, %v86_v57 }
  0xb3   :  { %v267_v8 = vadd.f32 %v266_v59, %v265_v50  ;;  %v275_v9 = vrot.slane %v274_v60, 2  ;;  %v68_v10 = vmul.f32 %v552_v19, %v546_v13  ;;  %v580_v18 = vstv %s46_s1 }
  0xb4   :  { %v218_v3 = vrot.slane %v217_v61, 2  ;;  %v224_v4 = vadd.f32 %v223_v62, %v222_v55  ;;  %v82_v16 = vrot.slane %v81_v5, 2  ;;  %v89_v17 = vrot.slane %v88_v6, 2 }
  0xb5   :  { %v282_v20 = vrot.slane %v281_v1, 2  ;;  %v73_v21 = vcombine.high %v67_v2, %v67_v2  ;;  %v583_v11 = vmul.f32 %v242_v22, %v544_v12  ;;  %v261_v28 = vrot.slane %v260_v7, 2 }
  0xb6   :  { %v219_v14 = vadd.f32 %v218_v3, %v217_v61  ;;  %v225_v15 = vrot.slane %v224_v4, 2  ;;  %v83_v26 = vadd.f32 %v82_v16, %v81_v5  ;;  %v90_v27 = vadd.f32 %v89_v17, %v88_v6 }
  0xb7   :  { %v74_v29 = vcombine.high %v68_v10, %v68_v10  ;;  %v93_v30 = vsel %vm78_vm0, %v67_v2, 0.0  ;;  %v588_v13 = vmul.f32 %v554_v23, %v544_v12  ;;  %v268_v31 = vrot.slane %v267_v8, 2 }
  0xb8   :  { %v220_v24 = vrot.slane %v219_v14, 1  ;;  %v226_v25 = vadd.f32 %v225_v15, %v224_v4  ;;  %v276_v32 = vadd.f32 %v275_v9, %v274_v60  ;;  %v84_v34 = vrot.slane %v83_v26, 1 }
  0xb9   :  { %v283_v35 = vadd.f32 %v282_v20, %v281_v1  ;;  %v91_v36 = vrot.slane %v90_v27, 1  ;;  %v94_v22 = vrot.slane %v93_v30, 4  ;;  %v100_v37 = vsel %vm78_vm0, %v73_v21, 0.0 }
  0xba   :  { %v227_v33 = vrot.slane %v226_v25, 1  ;;  %v221_v38 = vadd.f32 %v220_v24, %v219_v14  ;;  %v85_v40 = vadd.f32 %v84_v34, %v83_v26  ;;  %v101_v41 = vrot.slane %v100_v37, 4 }
  0xbb   :  { %v92_v44 = vadd.f32 %v91_v36, %v90_v27  ;;  %v95_v45 = vadd.f32 %v94_v22, %v93_v30  ;;  %v107_v23 = vsel %vm78_vm0, %v68_v10, 0.0  ;;  %v114_v46 = vsel %vm78_vm0, %v74_v29, 0.0 }
  0xbc   :  { %v228_v39 = vadd.f32 %v227_v33, %v226_v25  ;;  %v102_v48 = vadd.f32 %v101_v41, %v100_v37  ;;  %v108_v49 = vrot.slane %v107_v23, 4  ;;  %v115_v50 = vrot.slane %v114_v46, 4 }
  0xbd   :  { %v96_v51 = vrot.slane %v95_v45, 2  ;;  %v123_v52 = vadd.f32 %v580_v18, %v92_v44  ;;  %v350_v53 = vmul.f32 %v591_v42, %v544_v12  ;;  %v599_v54 = vmul.f32 %v245_v43, %v544_v12 }
  0xbe   :  { %v229_v47 = vadd.f32 %v228_v39, %v221_v38  ;;  %v262_v55 = vadd.f32 %v261_v28, %v260_v7  ;;  %v103_v56 = vrot.slane %v102_v48, 2  ;;  %v109_v57 = vadd.f32 %v108_v49, %v107_v23 }
  0xbf   :  { %v116_v58 = vadd.f32 %v115_v50, %v114_v46  ;;  %v269_v59 = vadd.f32 %v268_v31, %v267_v8  ;;  %v277_v60 = vrot.slane %v276_v32, 1  ;;  %v284_v61 = vrot.slane %v283_v35, 1 }
  0xc0   :  { %230 = vadd.xlane.f32.xlu1 %v229_v47  ;;  %v97_v62 = vadd.f32 %v96_v51, %v95_v45  ;;  %v104_v63 = vadd.f32 %v103_v56, %v102_v48  ;;  %v110_v0 = vrot.slane %v109_v57, 2  ;;  %v122_v2 = vadd.f32 %v580_v18, %v85_v40 }
  0xc1   :  { %v117_v1 = vrot.slane %v116_v58, 2  ;;  %v129_v4 = vmul.f32 0.5, %v123_v52  ;;  %v364_v12 = vsel %vm78_vm0, %v583_v11, 0.0  ;;  %v365_v5 = vsel %vm78_vm0, %v588_v13, 0.0 }
  0xc2   :  { %v98_v3 = vrot.slane %v97_v62, 1  ;;  %v263_v6 = vrot.slane %v262_v55, 1  ;;  %v105_v7 = vrot.slane %v104_v63, 1  ;;  %v111_v9 = vadd.f32 %v110_v0, %v109_v57 }
  0xc3   :  { %v118_v8 = vadd.f32 %v117_v1, %v116_v58  ;;  %v270_v10 = vrot.slane %v269_v59, 1  ;;  %v278_v14 = vadd.f32 %v277_v60, %v276_v32  ;;  %v366_v16 = vadd.f32 %v365_v5, %v364_v12 }
  0xc4   :  { %v99_v15 = vadd.f32 %v98_v3, %v97_v62  ;;  %v285_v17 = vadd.f32 %v284_v61, %v283_v35  ;;  %v106_v20 = vadd.f32 %v105_v7, %v104_v63  ;;  %v112_v21 = vrot.slane %v111_v9, 1 }
  0xc5   :  { %v128_v24 = vmul.f32 0.5, %v122_v2  ;;  %v119_v25 = vrot.slane %v118_v8, 1  ;;  %421 = vtanh.f32 %v129_v4  ;;  %v356_v27 = vcombine.high %v583_v11, %v583_v11 }
  0xc6   :  { %v124_v26 = vadd.f32 %v580_v18, %v99_v15  ;;  %v113_v28 = vadd.f32 %v112_v21, %v111_v9  ;;  %v125_v29 = vadd.f32 %v580_v18, %v106_v20  ;;  %v357_v30 = vcombine.high %v588_v13, %v588_v13 }
  0xc7   :  { %v367_v31 = vsel %vm78_vm0, %v350_v53, 0.0  ;;  %v120_v32 = vadd.f32 %v119_v25, %v118_v8  ;;  %v358_v34 = vcombine.high %v350_v53, %v350_v53  ;;  %423 = vtanh.f32 %v128_v24 }
  0xc8   :  { %v130_v33 = vmul.f32 0.5, %v124_v26  ;;  %v368_v35 = vadd.f32 %v367_v31, %v366_v16  ;;  %v126_v36 = vadd.f32 %v580_v18, %v113_v28  ;;  %v131_v22 = vmul.f32 0.5, %v125_v29 }
  0xc9   :  { %v369_v37 = vsel %vm78_vm0, %v599_v54, 0.0  ;;  %v127_v11 = vadd.f32 %v580_v18, %v120_v32  ;;  %v359_v38 = vcombine.high %v599_v54, %v599_v54  ;;  %v371_v40 = vsel %vm78_vm0, %v356_v27, 0.0 }
  0xca   :  { %425 = vtanh.f32 %v130_v33  ;;  %v370_v13 = vadd.f32 %v369_v37, %v368_v35  ;;  %v132_v39 = vmul.f32 0.5, %v126_v36  ;;  %v372_v41 = vsel %vm78_vm0, %v357_v30, 0.0 }
  0xcb   :  { %427 = vtanh.f32 %v131_v22  ;;  %v271_v43 = vadd.f32 %v270_v10, %v269_v59  ;;  %v133_v44 = vmul.f32 0.5, %v127_v11  ;;  %v373_v45 = vadd.f32 %v372_v41, %v371_v40 }
  0xcc   :  { %v303_v23 = vadd.f32 %v285_v17, %v580_v18  ;;  %429 = vtanh.f32 %v132_v39  ;;  %v374_v46 = vsel %vm78_vm0, %v358_v34, 0.0  ;;  %v378_v47 = vsel %vm78_vm0, %v370_v13, 0.0 }
  0xcd   :  { %v264_v48 = vadd.f32 %v263_v6, %v262_v55  ;;  %431 = vtanh.f32 %v133_v44  ;;  %v375_v49 = vadd.f32 %v374_v46, %v373_v45  ;;  %v379_v50 = vrot.slane %v378_v47, 4 }
  0xce   :  { %v302_v51 = vadd.f32 %v278_v14, %v580_v18  ;;  %v376_v52 = vsel %vm78_vm0, %v359_v38, 0.0  ;;  %v248_v53 = vmul.f32 %v591_v42, %v552_v19  ;;  %v301_v56 = vadd.f32 %v271_v43, %v580_v18 }
  0xcf   :  { %v422_v54 = vpop.eup %421  ;;  %v377_v57 = vadd.f32 %v376_v52, %v375_v49  ;;  %v380_v58 = vadd.f32 %v379_v50, %v378_v47  ;;  %v309_v59 = vmul.f32 0.5, %v303_v23  ;;  %v300_v55 = vadd.f32 %v264_v48, %v580_v18 }
  0xd0   :  { %v254_v60 = vcombine.high %v248_v53, %v248_v53  ;;  %v286_v61 = vsel %vm78_vm0, %v248_v53, 0.0  ;;  %v308_v2 = vmul.f32 0.5, %v302_v51  ;;  %v141_v3 = vadd.f32 1.0, %v422_v54 }
  0xd1   :  { %v381_v62 = vrot.slane %v380_v58, 2  ;;  %v385_v63 = vsel %vm78_vm0, %v377_v57, 0.0  ;;  %v287_v0 = vrot.slane %v286_v61, 4  ;;  %v424_v1 = vpop.eup %423  ;;  %v307_v12 = vmul.f32 0.5, %v301_v56 }
  0xd2   :  { %v386_v19 = vrot.slane %v385_v63, 4  ;;  %v293_v42 = vsel %vm78_vm0, %v254_v60, 0.0  ;;  %433 = vtanh.f32 %v309_v59  ;;  %v140_v14 = vadd.f32 1.0, %v424_v1 }
  0xd3   :  { %v288_v5 = vadd.f32 %v287_v0, %v286_v61  ;;  %v294_v6 = vrot.slane %v293_v42, 4  ;;  %v382_v8 = vadd.f32 %v381_v62, %v380_v58  ;;  %v306_v21 = vmul.f32 0.5, %v300_v55 }
  0xd4   :  { %v426_v4 = vpop.eup %425  ;;  %v387_v10 = vadd.f32 %v386_v19, %v385_v63  ;;  %435 = vtanh.f32 %v308_v2  ;;  %v147_v24 = vmul.f32 0.5, %v141_v3  ;;  %v146_v35 = vmul.f32 0.5, %v140_v14 }
  0xd5   :  { %v428_v7 = vpop.eup %427  ;;  %v142_v9 = vadd.f32 1.0, %v426_v4  ;;  %v289_v16 = vrot.slane %v288_v5, 2  ;;  %v295_v17 = vadd.f32 %v294_v6, %v293_v42  ;;  %v383_v32 = vrot.slane %v382_v8, 1 }
  0xd6   :  { %v143_v15 = vadd.f32 1.0, %v428_v7  ;;  %v430_v20 = vpop.eup %429  ;;  %v388_v25 = vrot.slane %v387_v10, 2  ;;  %437 = vtanh.f32 %v307_v12  ;;  %v158_v39 = vcombine.low %v146_v35, %v147_v24 }
  0xd7   :  { %v432_v26 = vpop.eup %431  ;;  %v144_v27 = vadd.f32 1.0, %v430_v20  ;;  %v148_v28 = vmul.f32 0.5, %v142_v9  ;;  %v290_v30 = vadd.f32 %v289_v16, %v288_v5  ;;  %v296_v34 = vrot.slane %v295_v17, 2 }
  0xd8   :  { %v149_v29 = vmul.f32 0.5, %v143_v15  ;;  %v145_v31 = vadd.f32 1.0, %v432_v26  ;;  %v389_v33 = vadd.f32 %v388_v25, %v387_v10  ;;  %439 = vtanh.f32 %v306_v21 }
  0xd9   :  { %v291_v22 = vrot.slane %v290_v30, 1  ;;  %v150_v37 = vmul.f32 0.5, %v144_v27  ;;  %v297_v13 = vadd.f32 %v296_v34, %v295_v17  ;;  %v384_v44 = vadd.f32 %v383_v32, %v382_v8 }
  0xda   :  { %v159_v36 = vcombine.low %v148_v28, %v149_v29  ;;  %v151_v11 = vmul.f32 0.5, %v145_v31  ;;  %v390_v38 = vrot.slane %v389_v33, 1  ;;  %v233_v24 = vstv %s412_s17 }
  0xdb   :  { %v292_v41 = vadd.f32 %v291_v22, %v290_v30  ;;  %v298_v23 = vrot.slane %v297_v13, 1 }
  0xdc   :  { %v161_v40 = vrot.slane %v159_v36, 7  ;;  %v160_v43 = vcombine.low %v150_v37, %v151_v11  ;;  %v391_v45 = vadd.f32 %v390_v38, %v389_v33  ;;  %v434_v48 = vpop.eup %433 }
  0xdd   :  { %v304_v47 = vadd.f32 %v292_v41, %v580_v18  ;;  %v299_v52 = vadd.f32 %v298_v23, %v297_v13  ;;  %v321_v58 = vadd.f32 1.0, %v434_v48 }
  0xde   :  { %v163_v46 = vsel %vm162_vm1, %v161_v40, %v158_v39  ;;  %v166_v50 = vrot.slane %v160_v43, 6  ;;  %v392_v51 = vadd.f32 %v391_v45, %v384_v44  ;;  %v436_v54 = vpop.eup %435 }
  0xdf   :  { %v165_v49 = vsel %vm164_vm2, %v161_v40, %v163_v46  ;;  %v310_v53 = vmul.f32 0.5, %v304_v47  ;;  %v305_v57 = vadd.f32 %v299_v52, %v580_v18  ;;  %v320_v55 = vadd.f32 1.0, %v436_v54 }
  0xe0   :  { %v168_v56 = vsel %vm167_vm3, %v166_v50, %v165_v49  ;;  %393 = vadd.xlane.f32.xlu1 %v392_v51  ;;  %v438_v61 = vpop.eup %437  ;;  %v327_v63 = vmul.f32 0.5, %v321_v58 }
  0xe1   :  { %v170_v59 = vsel %vm169_vm4, %v166_v50, %v168_v56  ;;  %441 = vtanh.f32 %v310_v53  ;;  %v311_v60 = vmul.f32 0.5, %v305_v57  ;;  %v319_v0 = vadd.f32 1.0, %v438_v61 }
  0xe2   :  { %172 = vst [vmem:[%s659_s4] sm:$0x77] %v170_v59  ;;  %v440_v62 = vpop.eup %439  ;;  %v326_v1 = vmul.f32 0.5, %v320_v55 }
  0xe3   :  { %443 = vtanh.f32 %v311_v60  ;;  %v318_v2 = vadd.f32 1.0, %v440_v62  ;;  %v325_v18 = vmul.f32 0.5, %v319_v0 }
  0xe4   :  { %v337_v3 = vcombine.low %v326_v1, %v327_v63 }
  0xe5   :  { %v324_v42 = vmul.f32 0.5, %v318_v2 }
  0xe6   :  { %v339_v4 = vrot.slane %v337_v3, 7 }
  0xe7   :  { %v336_v6 = vcombine.low %v324_v42, %v325_v18 }
  0xe9   :  { %v340_v9 = vsel %vm162_vm1, %v339_v4, %v336_v6 }
  0xea   :  { %v341_v15 = vsel %vm164_vm2, %v339_v4, %v340_v9 }
  0xeb   :  { %v442_v19 = vpop.eup %441 }
  0xec   :  { %v322_v12 = vadd.f32 1.0, %v442_v19 }
  0xed   :  { %v444_v5 = vpop.eup %443 }
  0xee   :  { %v323_v7 = vadd.f32 1.0, %v444_v5  ;;  %v328_v8 = vmul.f32 0.5, %v322_v12 }
  0xf0   :  { %v329_v10 = vmul.f32 0.5, %v323_v7 }
  0xf2   :  { %v338_v14 = vcombine.low %v328_v8, %v329_v10 }
  0xf4   :  { %v342_v16 = vrot.slane %v338_v14, 6 }
  0xf6   :  { %v343_v17 = vsel %vm167_vm3, %v342_v16, %v341_v15 }
  0xf7   :  { %v344_v20 = vsel %vm169_vm4, %v342_v16, %v343_v17 }
  0xf8   :  { %413 = vst [vmem:[%s659_s4 + $0x8] sm:$0x77] %v344_v20 }
 0x14d   :  { %v231_v21 = vpop.xlane.xlu1 %230 }
 0x14e   :  { %v232_v25 = vmul.f32 0.0009765625, %v231_v21 }
 0x150   :  { %v234_v26 = vadd.f32 %v233_v24, %v232_v25 }
 0x152   :  { %v235_v27 = vmul.f32 0.5, %v234_v26 }
 0x154   :  { %445 = vtanh.f32 %v235_v27 }
 0x15e   :  { %v446_v28 = vpop.eup %445 }
 0x15f   :  { %v237_v29 = vadd.f32 1.0, %v446_v28 }
 0x161   :  { %v238_v30 = vmul.f32 0.5, %v237_v29 }
 0x163   :  { %240 = vst.msk [vmem:[%s660_s5] sm:$0x1] %vm239_vm5, %v238_v30 }
 0x16d   :  { %v394_v31 = vpop.xlane.xlu1 %393 }
 0x16e   :  { %v395_v32 = vmul.f32 0.0009765625, %v394_v31 }
 0x170   :  { %v396_v33 = vadd.f32 %v395_v32, %v233_v24 }
 0x172   :  { %v397_v34 = vmul.f32 0.5, %v396_v33 }
 0x174   :  { %447 = vtanh.f32 %v397_v34 }
 0x17e   :  { %v448_v35 = vpop.eup %447 }
 0x17f   :  { %v399_v36 = vadd.f32 1.0, %v448_v35 }
 0x181   :  { %v400_v22 = vmul.f32 0.5, %v399_v36 }
 0x183   :  { %401 = vst.msk [vmem:[%s660_s5 + $0x1] sm:$0x1] %vm239_vm5, %v400_v22 }
 0x184   :  { %410 = vsyncpa [#allocation3], 1 }
 0x185   :  { %411 = vsyncpa [#allocation4], 1 }

</bundles_post_ra>
